<compile_context>
chip_gen: v6e
topology: v6e:2x2x1
jax: 0.10.0
libtpu: 0.0.40
codegen_flags: <defaults>
</compile_context>

<pallas_src>
import functools

import jax
import jax.numpy as jnp
from jax.experimental import pallas as pl
from jax.experimental.pallas import tpu as pltpu

LANE = 128
SUBLANE = 8
DEFAULT_EMA_BLOCK_ROWS = 2048  # 1 MiB/tile f32; 6 MiB double-buffered across 3 slabs


def _round_up(x, m):
    return pl.cdiv(x, m) * m


# --------------------------------------------------------------------------
# Kernel 1: EMA parameter update  (update_ema_model)
#     teacher_new = student * (1 - momentum) + teacher * momentum
# --------------------------------------------------------------------------
def _ema_kernel(mom_ref, s_ref, t_ref, o_ref):
    m = mom_ref[0]                                   # SMEM scalar momentum
    o_ref[...] = s_ref[...] * (1.0 - m) + t_ref[...] * m


@functools.partial(jax.jit, static_argnames=("block_rows",), donate_argnums=(2,))
def ema_update_slab(mom, student_slab, teacher_slab, *, block_rows):
    """EMA-lerp two persistent (rows_pad, 128) f32 slabs; teacher updated in place."""
    rows_pad = student_slab.shape[0]
    n_blocks = rows_pad // block_rows
    return pl.pallas_call(
        _ema_kernel,
        out_shape=jax.ShapeDtypeStruct((rows_pad, LANE), jnp.float32),
        grid=(n_blocks,),
        in_specs=[
            pl.BlockSpec(memory_space=pltpu.MemorySpace.SMEM),       # momentum
            pl.BlockSpec((block_rows, LANE), lambda i: (i, 0)),      # student
            pl.BlockSpec((block_rows, LANE), lambda i: (i, 0)),      # teacher
        ],
        out_specs=pl.BlockSpec((block_rows, LANE), lambda i: (i, 0)),
        input_output_aliases={2: 0},                                 # teacher -> out
        compiler_params=pltpu.CompilerParams(
            dimension_semantics=("parallel",)),
    )(mom, student_slab, teacher_slab)


# --------------------------------------------------------------------------
# Kernel 2: batched mean reduction  (parse_loss)
#     one pallas_call for ALL loss tensors; grid over tensors.
# --------------------------------------------------------------------------
def _batched_mean_kernel(inv_ref, x_ref, o_ref):
    i = pl.program_id(0)
    mean = jnp.sum(x_ref[...]) * inv_ref[i]          # reciprocal-multiply, no divide
    o_ref[...] = jnp.ones_like(o_ref) * mean         # full-lane unmasked store


def batched_means(tensors):
    """Means of a list of arbitrarily-shaped/sized tensors in one Pallas call."""
    num_t = len(tensors)
    flats = [jnp.ravel(t).astype(jnp.float32) for t in tensors]
    ns = [int(f.shape[0]) for f in flats]
    rows = _round_up(pl.cdiv(max(ns), LANE), SUBLANE)
    slab_elems = rows * LANE
    slab = jnp.stack([jnp.pad(f, (0, slab_elems - n)).reshape(rows, LANE)
                      for f, n in zip(flats, ns)])               # (T, rows, 128)
    inv = jnp.array([1.0 / n for n in ns], jnp.float32)          # SMEM 1/n vector

    out = pl.pallas_call(
        _batched_mean_kernel,
        out_shape=jax.ShapeDtypeStruct((num_t, SUBLANE, LANE), jnp.float32),
        grid=(num_t,),
        in_specs=[
            pl.BlockSpec(memory_space=pltpu.MemorySpace.SMEM),
            pl.BlockSpec((1, rows, LANE), lambda i: (i, 0, 0)),
        ],
        out_specs=pl.BlockSpec((1, SUBLANE, LANE), lambda i: (i, 0, 0)),
        compiler_params=pltpu.CompilerParams(
            dimension_semantics=("parallel",)),
    )(inv, slab)
    return out[:, 0, 0]


def parse_loss(losses):
    """Port of SemiBaseDetector.parse_loss with a single batched Pallas reduction."""
    tensors, layout = [], []
    for name, value in losses.items():
        if isinstance(value, (list, tuple)):
            layout.append((name, len(value)))
            tensors.extend(value)
        else:
            layout.append((name, None))
            tensors.append(value)
    means = batched_means(tensors)
    out, idx = {}, 0
    for name, cnt in layout:
        if cnt is None:
            out[name] = means[idx]
            idx += 1
        else:
            out[name] = sum(means[idx + k] for k in range(cnt))
            idx += cnt
    return out


# --------------------------------------------------------------------------
# Kernel 3: bbox rescale  (rescale_bboxes:  bboxes.view(N,-1,4) / scale_factor)
#     lane-dense slab * reciprocal-scale lane pattern
# --------------------------------------------------------------------------
def _rescale_kernel(b_ref, inv_ref, o_ref):
    o_ref[...] = b_ref[...] * inv_ref[...]           # (rows,128) * (1,128) broadcast


def rescale_bboxes(bboxes, scale_factor):
    """bboxes: (N, d) f32 with d % 4 == 0; scale_factor: (4,) array or python float."""
    n, d = bboxes.shape
    assert d % 4 == 0, "bbox last dim must be a multiple of 4"
    total = n * d
    rows = _round_up(pl.cdiv(total, LANE), SUBLANE)
    flat = jnp.pad(bboxes.reshape(-1).astype(jnp.float32),
                   (0, rows * LANE - total)).reshape(rows, LANE)

    if isinstance(scale_factor, float):
        inv_pattern = jnp.full((1, LANE), 1.0 / scale_factor, jnp.float32)
    else:
        sf = jnp.asarray(scale_factor, jnp.float32)
        assert sf.shape == (4,), "scale_factor must have 4 entries"
        inv_pattern = jnp.tile(1.0 / sf, LANE // 4).reshape(1, LANE)

    out = pl.pallas_call(
        _rescale_kernel,
        out_shape=jax.ShapeDtypeStruct((rows, LANE), jnp.float32),
        in_specs=[
            pl.BlockSpec((rows, LANE), lambda: (0, 0)),
            pl.BlockSpec((1, LANE), lambda: (0, 0)),
        ],
        out_specs=pl.BlockSpec((rows, LANE), lambda: (0, 0)),
    )(flat, inv_pattern)
    # TODO(synk): bbox_transform callbacks in the original are host-side numpy; skipped.
    return out.reshape(-1)[:total].reshape(n, d)


# --------------------------------------------------------------------------
# SemiBaseDetector (JAX/Pallas)
# --------------------------------------------------------------------------
class SemiBaseDetectorPallas:
    """Synthetic stand-in for SemiBaseDetector: deterministic parameter init,
    persistent lane-dense student/teacher slabs, and the concrete compute
    methods lowered to Pallas."""

    # small synthetic detector parameter shapes (tiny conv neck + head)
    PARAM_SHAPES = {
        "backbone.conv1.weight": (16, 4, 3, 3),
        "backbone.conv1.bias": (16,),
        "backbone.conv2.weight": (32, 16, 3, 3),
        "backbone.conv2.bias": (32,),
        "bbox_head.cls.weight": (5, 32),
        "bbox_head.cls.bias": (5,),
    }

    def __init__(self, key):
        keys = jax.random.split(key, len(self.PARAM_SHAPES) * 2)
        self.params = {}
        teacher = {}
        self._layout = {}            # name -> (offset, size, shape)
        off = 0
        for i, (name, shape) in enumerate(self.PARAM_SHAPES.items()):
            p = 0.1 * jax.random.normal(keys[2 * i], shape, jnp.float32)
            t = p + 0.01 * jax.random.normal(keys[2 * i + 1], shape, jnp.float32)
            self.params[name] = p
            teacher[name] = t
            sz = 1
            for s in shape:
                sz *= s
            self._layout[name] = (off, sz, shape)
            off += sz
        self._n_elems = off

        # persistent lane-dense slabs (built ONCE; no per-step concat/pad/split)
        rows = pl.cdiv(self._n_elems, LANE)
        self._block_rows = min(DEFAULT_EMA_BLOCK_ROWS, _round_up(rows, SUBLANE))
        self._rows_pad = _round_up(rows, self._block_rows)
        self.student_slab = self._to_slab(self.params)
        self.teacher_slab = self._to_slab(teacher)

    def _to_slab(self, tensors):
        flat = jnp.concatenate([tensors[n].reshape(-1).astype(jnp.float32)
                                for n in self.PARAM_SHAPES])
        pad = self._rows_pad * LANE - self._n_elems
        return jnp.pad(flat, (0, pad)).reshape(self._rows_pad, LANE)

    def set_student_params(self, params):
        """Refresh the persistent student slab after an optimizer step."""
        self.params = params
        self.student_slab = self._to_slab(params)

    def ema_params(self):
        """Materialize named teacher tensors from the persistent slab (view only
        when individual tensors are actually needed)."""
        flat = self.teacher_slab.reshape(-1)
        return {name: flat[off:off + sz].reshape(shape)
                for name, (off, sz, shape) in self._layout.items()}

    def update_ema_model(self, momentum=0.99):
        mom = jnp.array([momentum], jnp.float32)     # SMEM scalar -> no recompile
        self.teacher_slab = ema_update_slab(
            mom, self.student_slab, self.teacher_slab,
            block_rows=self._block_rows)
        return self.teacher_slab

    # TODO(synk): forward()/forward_train()/forward_test() are abstract dispatchers
    #             implemented only in subclasses; nothing to lower here.
    # TODO(synk): split_pos_ig() produces data-dependent (dynamic) output shapes and
    #             is left on the host.


if __name__ == "__main__":
    key = jax.random.PRNGKey(0)
    k_det, k_l1, k_l2a, k_l2b, k_l3, k_box = jax.random.split(key, 6)

    det = SemiBaseDetectorPallas(k_det)

    # ---- 1. EMA update (persistent slabs, in-place teacher) ------------------
    momentum = 0.99
    teacher_before = det.ema_params()                # materialized copies
    ref_ema = {n: det.params[n] * (1.0 - momentum) + teacher_before[n] * momentum
               for n in det.PARAM_SHAPES}

    det.update_ema_model(momentum=momentum)
    new_ema = det.ema_params()
    got = jnp.concatenate([jax.block_until_ready(new_ema[n]).reshape(-1)
                           for n in det.PARAM_SHAPES])
    ref = jnp.concatenate([ref_ema[n].reshape(-1) for n in det.PARAM_SHAPES])
    assert jnp.allclose(got, ref, atol=1e-6, rtol=1e-6)

    # ---- 2. parse_loss (single batched Pallas reduction, incl. n > 1024) -----
    losses = {
        "loss_cls": jax.random.normal(k_l1, (2, 3), jnp.float32),
        "loss_bbox": [jax.random.normal(k_l2a, (4,), jnp.float32),
                      jax.random.normal(k_l2b, (2, 5), jnp.float32)],
        "loss_iou": jax.random.normal(k_l3, (40, 40), jnp.float32),   # 1600 > 1024
    }
    parsed = jax.block_until_ready(parse_loss(losses))
    assert jnp.allclose(parsed["loss_cls"], jnp.mean(losses["loss_cls"]),
                        atol=1e-5, rtol=1e-5)
    ref_bbox = jnp.mean(losses["loss_bbox"][0]) + jnp.mean(losses["loss_bbox"][1])
    assert jnp.allclose(parsed["loss_bbox"], ref_bbox, atol=1e-5, rtol=1e-5)
    assert jnp.allclose(parsed["loss_iou"], jnp.mean(losses["loss_iou"]),
                        atol=1e-5, rtol=1e-5)

    # ---- 3. rescale_bboxes (lane-dense reciprocal multiply) -------------------
    bboxes = 10.0 * jax.random.uniform(k_box, (8, 4), jnp.float32)
    scale_factor = jnp.array([1.5, 1.5, 2.0, 2.0], jnp.float32)
    rescaled = jax.block_until_ready(rescale_bboxes(bboxes, scale_factor))
    ref_rescaled = (bboxes.reshape(8, 1, 4) / scale_factor).reshape(8, 4)
    assert jnp.allclose(rescaled, ref_rescaled, atol=1e-5, rtol=1e-5)

    print("KERNEL_OK")
</pallas_src>

<mosaic_0001>
module attributes {stable_mosaic.version = 11 : i64} {
  func.func @_ema_kernel(%arg0: i32, %arg1: memref<1xf32, #tpu.memory_space<smem>>, %arg2: memref<48x128xf32, #tpu.memory_space<vmem>>, %arg3: memref<48x128xf32, #tpu.memory_space<vmem>>, %arg4: memref<48x128xf32, #tpu.memory_space<vmem>>) attributes {dimension_semantics = [#tpu.dimension_semantics<parallel>], iteration_bounds = array<i64: 1>, scalar_prefetch = 0 : i64, scratch_operands = 0 : i64, tpu.core_type = #tpu.core_type<tc>, window_params = [{transform_indices = @transform_0, window_bounds = array<i64: 1>}, {transform_indices = @transform_1, window_bounds = array<i64: 48, 128>}, {transform_indices = @transform_2, window_bounds = array<i64: 48, 128>}, {transform_indices = @transform_3, window_bounds = array<i64: 48, 128>}]} {
    %c0 = arith.constant 0 : index
    %0 = memref.load %arg1[%c0] : memref<1xf32, #tpu.memory_space<smem>>
    %c0_0 = arith.constant 0 : index
    %c0_1 = arith.constant 0 : index
    %1 = vector.load %arg2[%c0_0, %c0_1] : memref<48x128xf32, #tpu.memory_space<vmem>>, vector<48x128xf32>
    %cst = arith.constant 1.000000e+00 : f32
    %2 = arith.subf %cst, %0 : f32
    %3 = vector.broadcast %2 : f32 to vector<48x128xf32>
    %4 = arith.mulf %1, %3 : vector<48x128xf32>
    %c0_2 = arith.constant 0 : index
    %c0_3 = arith.constant 0 : index
    %5 = vector.load %arg3[%c0_2, %c0_3] : memref<48x128xf32, #tpu.memory_space<vmem>>, vector<48x128xf32>
    %6 = vector.broadcast %0 : f32 to vector<48x128xf32>
    %7 = arith.mulf %5, %6 : vector<48x128xf32>
    %8 = arith.addf %4, %7 : vector<48x128xf32>
    %c0_4 = arith.constant 0 : index
    %c0_5 = arith.constant 0 : index
    %9 = vector.load %arg4[%c0_4, %c0_5] : memref<48x128xf32, #tpu.memory_space<vmem>>, vector<48x128xf32>
    tpu.vector_store %arg4[%c0_4, %c0_5], %8 {strides = array<i32>} : memref<48x128xf32, #tpu.memory_space<vmem>>, vector<48x128xf32>,
    return
  }
  func.func @transform_0(%arg0: i32) -> i32 {
    %c0_i32 = arith.constant 0 : i32
    %c0_i32_0 = arith.constant 0 : i32
    return %c0_i32 : i32
  }
  func.func @transform_1(%arg0: i32) -> (i32, i32) {
    %c0_i32 = arith.constant 0 : i32
    %c0_i32_0 = arith.constant 0 : i32
    return %arg0, %c0_i32 : i32, i32
  }
  func.func @transform_2(%arg0: i32) -> (i32, i32) {
    %c0_i32 = arith.constant 0 : i32
    %c0_i32_0 = arith.constant 0 : i32
    return %arg0, %c0_i32 : i32, i32
  }
  func.func @transform_3(%arg0: i32) -> (i32, i32) {
    %c0_i32 = arith.constant 0 : i32
    %c0_i32_0 = arith.constant 0 : i32
    return %arg0, %c0_i32 : i32, i32
  }
}

</mosaic_0001>

<bundles_post_ra>
// kernel: ema_update_slab.1
= control target key start
LH: loop header
LB: loop body
LE: loop exit
PB: predicated region body
PF: predicated region fallthrough
CT: control target
= control target key end

     0   :  { %9 = vsyncpa [#allocation4], 0  ;;  %s222_s0 = inlined_call_operand.<no memory space> [shape: f32[1], index: 0, kind: input, shape index: {}]   ;;  %s223_s1 = inlined_call_operand.hbm [shape: f32[48,128], index: 1, kind: input, shape index: {}]   ;;  %s224_s2 = inlined_call_operand.hbm [shape: f32[48,128], index: 2, kind: input, shape index: {}, may-alias: {2,3}]   ;;  %s225_s3 = inlined_call_operand.hbm [shape: f32[48,128], index: 3, kind: output, shape index: {}, may-alias: {2,3}]  }
   0x1   :  { %10 = vsyncpa [#allocation7], 0 }
   0x2   :  { %11 = vsyncpa [#allocation5], 0  ;;  %s173_s12 = smov [#allocation3]  }
   0x3   :  { %s19_s13 = sshll.u32 %s173_s12, 4  ;;  %s20_s13 = int_to_ptr.vmem [resolvable:$true] %s19_s13 }
   0x4   :  { %s115_s14 = scalar_lea.vmem %s20_s13, 768  ;;  %p120_p1 = scmp.lt.s32.totalorder %s20_s13, %s20_s13 }
   0x5   :  { %p116_p0 = scmp.ne.s32.totalorder %s20_s13, %s115_s14  ;;  %p121_p2 = scmp.lt.s32.totalorder %s115_s14, %s115_s14 }
   0x7   :  { %p122_p3 = por %p121_p2, %p120_p1 }
   0x9   :  { %p123_p4 = pnand %p122_p3, %p116_p0 }
   0xb   :  { %126 = shalt.err (!%p123_p4)
}
   0xc   :  { %s174_s15 = smov 128   ;;  %s175_s16 = smov 8  }
   0xd   :  { %25 = dma.hbm_to_vmem [thread:$0]  %s223_s1, 768, %s20_s13, [#allocation4], %s174_s15, %s174_s15, %s175_s16  }
   0xe   :  { %s176_s19 = smov [#allocation6]  }
   0xf   :  { %s31_s20 = sshll.u32 %s176_s19, 4  ;;  %s32_s20 = int_to_ptr.vmem [resolvable:$true] %s31_s20 }
  0x10   :  { %s135_s21 = scalar_lea.vmem %s32_s20, 768  ;;  %p140_p6 = scmp.lt.s32.totalorder %s32_s20, %s32_s20 }
  0x11   :  { %p136_p5 = scmp.ne.s32.totalorder %s32_s20, %s135_s21  ;;  %p141_p7 = scmp.lt.s32.totalorder %s135_s21, %s135_s21 }
  0x13   :  { %p142_p8 = por %p141_p7, %p140_p6 }
  0x15   :  { %p143_p9 = pnand %p142_p8, %p136_p5 }
  0x17   :  { %146 = shalt.err (!%p143_p9)
}
  0x18   :  { %37 = dma.hbm_to_vmem [thread:$0]  %s224_s2, 768, %s32_s20, [#allocation7], %s174_s15, %s174_s15, %s175_s16  }
  0x19   :  { %167 = dma.done.wait [#allocation4], 768  }
  0x1a   :  { %168 = vsyncadd [#allocation4], 4294966528 }
  0x1b   :  { %169 = dma.done.wait [#allocation7], 768  }
  0x1c   :  { %170 = vsyncadd [#allocation7], 4294966528  ;;  %s51_s25 = ssub.f32 1.0, %s222_s0  ;;  %v65_v1 = vstv %s222_s0  ;;  %v45_v2 = vld [vmem:[#allocation3] sm:$0xff]  ;;  %v59_v3 = vld [vmem:[#allocation6] sm:$0xff]  ;;  %s177_s0 = smov [#allocation8]  }
  0x1d   :  { %v46_v4 = vld [vmem:[#allocation3 + $0x8] sm:$0xff]  ;;  %v66_v6 = vmul.f32 %v65_v1, %v59_v3  ;;  %v60_v8 = vld [vmem:[#allocation6 + $0x8] sm:$0xff]  ;;  %v47_v9 = vld [vmem:[#allocation3 + $0x10] sm:$0xff]  ;;  %s89_s2 = sshll.u32 %s177_s0, 4  ;;  %s90_s2 = int_to_ptr.vmem [resolvable:$true] %s89_s2 }
  0x1e   :  { %v52_v0 = vstv %s51_s25  ;;  %v61_v10 = vld [vmem:[#allocation6 + $0x10] sm:$0xff]  ;;  %v67_v11 = vmul.f32 %v65_v1, %v60_v8  ;;  %v48_v14 = vld [vmem:[#allocation3 + $0x18] sm:$0xff]  ;;  %v62_v15 = vld [vmem:[#allocation6 + $0x18] sm:$0xff]  ;;  %s147_s28 = scalar_lea.vmem %s90_s2, 768  ;;  %p152_p11 = scmp.lt.s32.totalorder %s90_s2, %s90_s2 }
  0x1f   :  { %v53_v5 = vmul.f32 %v52_v0, %v45_v2  ;;  %v54_v7 = vmul.f32 %v52_v0, %v46_v4  ;;  %v55_v12 = vmul.f32 %v52_v0, %v47_v9  ;;  %v68_v13 = vmul.f32 %v65_v1, %v61_v10  ;;  %v49_v16 = vld [vmem:[#allocation3 + $0x20] sm:$0xff]  ;;  %v63_v21 = vld [vmem:[#allocation6 + $0x20] sm:$0xff]  ;;  %v50_v22 = vld [vmem:[#allocation3 + $0x28] sm:$0xff]  ;;  %p148_p10 = scmp.ne.s32.totalorder %s90_s2, %s147_s28  ;;  %p153_p12 = scmp.lt.s32.totalorder %s147_s28, %s147_s28 }
  0x20   :  { %v56_v18 = vmul.f32 %v52_v0, %v48_v14  ;;  %v69_v19 = vmul.f32 %v65_v1, %v62_v15  ;;  %v57_v20 = vmul.f32 %v52_v0, %v49_v16  ;;  %v64_v23 = vld [vmem:[#allocation6 + $0x28] sm:$0xff]  ;;  %v70_v26 = vmul.f32 %v65_v1, %v63_v21 }
  0x21   :  { %v72_v17 = vadd.f32 %v66_v6, %v53_v5  ;;  %v73_v24 = vadd.f32 %v67_v11, %v54_v7  ;;  %v74_v25 = vadd.f32 %v68_v13, %v55_v12  ;;  %v58_v27 = vmul.f32 %v52_v0, %v50_v22  ;;  %p154_p13 = por %p153_p12, %p152_p11 }
  0x22   :  { %v75_v28 = vadd.f32 %v69_v19, %v56_v18  ;;  %v71_v29 = vmul.f32 %v65_v1, %v64_v23  ;;  %v76_v30 = vadd.f32 %v70_v26, %v57_v20 }
  0x23   :  { %78 = vst [vmem:[#allocation8] sm:$0xff] %v72_v17  ;;  %79 = vst [vmem:[#allocation8 + $0x8] sm:$0xff] %v73_v24  ;;  %p155_p0 = pnand %p154_p13, %p148_p10 }
  0x24   :  { %80 = vst [vmem:[#allocation8 + $0x10] sm:$0xff] %v74_v25  ;;  %81 = vst [vmem:[#allocation8 + $0x18] sm:$0xff] %v75_v28  ;;  %v77_v31 = vadd.f32 %v71_v29, %v58_v27 }
  0x25   :  { %82 = vst [vmem:[#allocation8 + $0x20] sm:$0xff] %v76_v30 }
  0x26   :  { %83 = vst [vmem:[#allocation8 + $0x28] sm:$0xff] %v77_v31 }
  0x27   :  { %158 = shalt.err (!%p155_p0)
}
  0x28   :  { %95 = dma.vmem_to_hbm [thread:$0]  %s90_s2, 768, %s225_s3, [#allocation5], %s174_s15, %s174_s15, %s175_s16  }
  0x29   :  { %171 = dma.done.wait [#allocation5], 768  }
  0x2a   :  { %172 = vsyncadd [#allocation5], 4294966528 }
  0x2b   :  { %99 = vsyncpa [#allocation4], 1 }
  0x2c   :  { %100 = vsyncpa [#allocation7], 1 }
  0x2d   :  { %101 = vsyncpa [#allocation5], 1 }

</bundles_post_ra>
